<compile_context>
chip_gen: v5e
topology: v5e:2x2
jax: 0.10.0
libtpu: 0.0.40
codegen_flags: <defaults>
</compile_context>

<pallas_src>
import functools

import jax
import jax.numpy as jnp
from jax.experimental import pallas as pl
from jax.experimental.pallas import tpu as pltpu


def _round_up(n, m):
    return ((n + m - 1) // m) * m


def _pad_to(a, shape):
    pads = [(0, t - s) for s, t in zip(a.shape, shape)]
    if all(p == (0, 0) for p in pads):
        return a
    return jnp.pad(a, pads)


def gru_cell_kernel(x_ref, h_ref, wx_ref, wh_ref, bx_ref, bhg_ref, o_ref, *, hidden):
    """One GRU-cell step on a (tile_b, *) batch tile.

    `hidden` is the padded hidden size (multiple of 128), so every gate slice
    below is a static, 128-aligned lane slice.
    """
    x = x_ref[...]
    h = h_ref[...]

    # Two fused MXU matmuls (f32 accumulation), one per input stream.
    # b_x already carries the r/z biases of both streams, so the h-stream
    # matmul needs no broadcast bias add.
    xrzg = jnp.dot(x, wx_ref[...], preferred_element_type=jnp.float32) + bx_ref[...]
    hrzg = jnp.dot(h, wh_ref[...], preferred_element_type=jnp.float32)

    # Static 128-aligned lane slices: r | z | g.
    xr = xrzg[:, 0 * hidden:1 * hidden]
    xz = xrzg[:, 1 * hidden:2 * hidden]
    xg = xrzg[:, 2 * hidden:3 * hidden]
    hr = hrzg[:, 0 * hidden:1 * hidden]
    hz = hrzg[:, 1 * hidden:2 * hidden]
    hg = hrzg[:, 2 * hidden:3 * hidden]

    r = jax.nn.sigmoid(xr + hr)
    z = jax.nn.sigmoid(xz + hz)
    # b_hg must sit inside the r * (...) product (matches the PyTorch forward).
    g = jnp.tanh(xg + r * (hg + bhg_ref[...]))

    h_f32 = h.astype(jnp.float32)
    # (1 - z) * g + z * h  ==  g + z * (h - g)   (one fewer VPU op)
    o_ref[...] = (g + z * (h_f32 - g)).astype(o_ref.dtype)


def my_gru_cell(x, h_prev, params, *, max_tile_b=256):
    """GRU cell forward.

    x:      (batch, input_size)
    h_prev: (batch, hidden_size)
    params: dict with W_xr/W_xz/W_xg of shape (input, hidden),
            W_hr/W_hz/W_hg of shape (hidden, hidden),
            and b_* biases of shape (1, hidden).
            (Weights are the transpose of PyTorch nn.Linear .weight.)
    """
    batch, input_size = x.shape
    hidden = h_prev.shape[1]

    # Padded (lane / sublane dense) sizes.
    input_p = _round_up(input_size, 128)
    hidden_p = _round_up(hidden, 128)

    # Adaptive batch tile: big enough to keep MXU M tall, small enough not to
    # over-pad tiny batches.  batch_p is an exact multiple of tile_b.
    n_steps = max(1, -(-batch // max_tile_b))
    tile_b = min(_round_up(-(-batch // n_steps), 8), max_tile_b)
    batch_p = tile_b * n_steps

    # Pad each per-gate weight to the dense size, then fuse gates along the
    # lane axis so the kernel issues 2 matmuls instead of 6.
    def pw_x(name):  # (input, hidden) -> (input_p, hidden_p)
        return _pad_to(params[name], (input_p, hidden_p))

    def pw_h(name):  # (hidden, hidden) -> (hidden_p, hidden_p)
        return _pad_to(params[name], (hidden_p, hidden_p))

    def pb(b):       # (1, hidden) -> (1, hidden_p)
        return _pad_to(b, (1, hidden_p))

    W_x = jnp.concatenate([pw_x("W_xr"), pw_x("W_xz"), pw_x("W_xg")], axis=1)
    W_h = jnp.concatenate([pw_h("W_hr"), pw_h("W_hz"), pw_h("W_hg")], axis=1)
    # x-stream bias carries the h-stream r/z biases too (exact: they are just
    # summed in the pre-activation).  b_hg stays separate (inside r * (...)).
    b_x = jnp.concatenate([
        pb(params["b_xr"] + params["b_hr"]),
        pb(params["b_xz"] + params["b_hz"]),
        pb(params["b_xg"]),
    ], axis=1)
    b_hg = pb(params["b_hg"])

    x_p = _pad_to(x, (batch_p, input_p))
    h_p = _pad_to(h_prev, (batch_p, hidden_p))

    grid = (batch_p // tile_b,)

    in_specs = [
        pl.BlockSpec((tile_b, input_p), lambda i: (i, 0)),          # x tile
        pl.BlockSpec((tile_b, hidden_p), lambda i: (i, 0)),         # h tile
        pl.BlockSpec((input_p, 3 * hidden_p), lambda i: (0, 0)),    # W_x (resident)
        pl.BlockSpec((hidden_p, 3 * hidden_p), lambda i: (0, 0)),   # W_h (resident)
        pl.BlockSpec((1, 3 * hidden_p), lambda i: (0, 0)),          # b_x (resident)
        pl.BlockSpec((1, hidden_p), lambda i: (0, 0)),              # b_hg (resident)
    ]
    out_specs = pl.BlockSpec((tile_b, hidden_p), lambda i: (i, 0))

    itemsize = jnp.dtype(x.dtype).itemsize
    bytes_accessed = (
        (x_p.size + h_p.size + batch_p * hidden_p) * itemsize
        + (W_x.size + W_h.size + b_x.size + b_hg.size) * jnp.dtype(W_x.dtype).itemsize
    )
    cost = pl.CostEstimate(
        flops=2 * batch_p * (input_p + hidden_p) * 3 * hidden_p,
        transcendentals=3 * batch_p * hidden_p,
        bytes_accessed=bytes_accessed,
    )

    out_p = pl.pallas_call(
        functools.partial(gru_cell_kernel, hidden=hidden_p),
        out_shape=jax.ShapeDtypeStruct((batch_p, hidden_p), x.dtype),
        grid=grid,
        in_specs=in_specs,
        out_specs=out_specs,
        compiler_params=pltpu.CompilerParams(
            dimension_semantics=("parallel",),
        ),
        cost_estimate=cost,
    )(x_p, h_p, W_x, W_h, b_x, b_hg)

    return out_p[:batch, :hidden]


def init_params(key, input_size, hidden_size, dtype=jnp.float32):
    """Deterministic synthetic parameters matching nn.Linear init
    (stored pre-transposed as (in, out))."""
    keys = jax.random.split(key, 12)

    def lin(kw, kb, fan_in, fan_out):
        bound = 1.0 / jnp.sqrt(fan_in)
        w = jax.random.uniform(kw, (fan_in, fan_out), dtype, -bound, bound)
        b = jax.random.uniform(kb, (1, fan_out), dtype, -bound, bound)
        return w, b

    W_xr, b_xr = lin(keys[0], keys[1], input_size, hidden_size)
    W_xz, b_xz = lin(keys[2], keys[3], input_size, hidden_size)
    W_xg, b_xg = lin(keys[4], keys[5], input_size, hidden_size)
    W_hr, b_hr = lin(keys[6], keys[7], hidden_size, hidden_size)
    W_hz, b_hz = lin(keys[8], keys[9], hidden_size, hidden_size)
    W_hg, b_hg = lin(keys[10], keys[11], hidden_size, hidden_size)
    return dict(
        W_xr=W_xr, W_xz=W_xz, W_xg=W_xg,
        W_hr=W_hr, W_hz=W_hz, W_hg=W_hg,
        b_xr=b_xr, b_xz=b_xz, b_xg=b_xg,
        b_hr=b_hr, b_hz=b_hz, b_hg=b_hg,
    )


def gru_cell_ref(x, h_prev, p):
    """Pure-JAX reference mirroring the PyTorch forward."""
    r = jax.nn.sigmoid(x @ p["W_xr"] + p["b_xr"] + h_prev @ p["W_hr"] + p["b_hr"])
    z = jax.nn.sigmoid(x @ p["W_xz"] + p["b_xz"] + h_prev @ p["W_hz"] + p["b_hz"])
    g = jnp.tanh(x @ p["W_xg"] + p["b_xg"] + r * (h_prev @ p["W_hg"] + p["b_hg"]))
    return (1.0 - z) * g + z * h_prev


if __name__ == "__main__":
    key = jax.random.PRNGKey(0)
    batch, input_size, hidden_size = 2, 16, 32

    k_x, k_h, k_p = jax.random.split(key, 3)
    x = jax.random.normal(k_x, (batch, input_size), jnp.float32)
    h_prev = jax.random.normal(k_h, (batch, hidden_size), jnp.float32)
    params = init_params(k_p, input_size, hidden_size)

    h_new = my_gru_cell(x, h_prev, params)
    jax.block_until_ready(h_new)

    h_ref = gru_cell_ref(x, h_prev, params)
    assert h_new.shape == (batch, hidden_size)
    assert jnp.allclose(h_new, h_ref, atol=2e-5, rtol=2e-5), (
        float(jnp.max(jnp.abs(h_new - h_ref)))
    )

    print("KERNEL_OK")
</pallas_src>

<mosaic_0001>
module attributes {stable_mosaic.version = 11 : i64} {
  func.func @gru_cell_kernel(%arg0: i32, %arg1: memref<8x128xf32, #tpu.memory_space<vmem>>, %arg2: memref<8x128xf32, #tpu.memory_space<vmem>>, %arg3: memref<128x384xf32, #tpu.memory_space<vmem>>, %arg4: memref<128x384xf32, #tpu.memory_space<vmem>>, %arg5: memref<1x384xf32, #tpu.memory_space<vmem>>, %arg6: memref<1x128xf32, #tpu.memory_space<vmem>>, %arg7: memref<8x128xf32, #tpu.memory_space<vmem>>) attributes {dimension_semantics = [#tpu.dimension_semantics<parallel>], iteration_bounds = array<i64: 1>, scalar_prefetch = 0 : i64, scratch_operands = 0 : i64, tpu.core_type = #tpu.core_type<tc>, window_params = [{transform_indices = @transform_0, window_bounds = array<i64: 8, 128>}, {transform_indices = @transform_1, window_bounds = array<i64: 8, 128>}, {pipeline_mode = #tpu.pipeline_mode<synchronous>, transform_indices = @transform_2, window_bounds = array<i64: 128, 384>}, {pipeline_mode = #tpu.pipeline_mode<synchronous>, transform_indices = @transform_3, window_bounds = array<i64: 128, 384>}, {pipeline_mode = #tpu.pipeline_mode<synchronous>, transform_indices = @transform_4, window_bounds = array<i64: 1, 384>}, {pipeline_mode = #tpu.pipeline_mode<synchronous>, transform_indices = @transform_5, window_bounds = array<i64: 1, 128>}, {transform_indices = @transform_6, window_bounds = array<i64: 8, 128>}]} {
    %c0 = arith.constant 0 : index
    %c0_0 = arith.constant 0 : index
    %0 = vector.load %arg1[%c0, %c0_0] : memref<8x128xf32, #tpu.memory_space<vmem>>, vector<8x128xf32>
    %c0_1 = arith.constant 0 : index
    %c0_2 = arith.constant 0 : index
    %1 = vector.load %arg2[%c0_1, %c0_2] : memref<8x128xf32, #tpu.memory_space<vmem>>, vector<8x128xf32>
    %c0_3 = arith.constant 0 : index
    %c0_4 = arith.constant 0 : index
    %2 = vector.load %arg3[%c0_3, %c0_4] : memref<128x384xf32, #tpu.memory_space<vmem>>, vector<128x384xf32>
    %cst = arith.constant dense<0.000000e+00> : vector<8x384xf32>
    %3 = tpu.matmul %0, %2, %cst {dimension_numbers = #tpu.dot_dimension_numbers<[1], [0], [0], [1], [0, 0, 1, 1], [], []>} : vector<8x128xf32>, vector<128x384xf32>, vector<8x384xf32> -> vector<8x384xf32>
    %c0_5 = arith.constant 0 : index
    %c0_6 = arith.constant 0 : index
    %4 = vector.load %arg5[%c0_5, %c0_6] : memref<1x384xf32, #tpu.memory_space<vmem>>, vector<1x384xf32>
    %5 = vector.broadcast %4 : vector<1x384xf32> to vector<8x384xf32>
    %6 = arith.addf %3, %5 : vector<8x384xf32>
    %c0_7 = arith.constant 0 : index
    %c0_8 = arith.constant 0 : index
    %7 = vector.load %arg4[%c0_7, %c0_8] : memref<128x384xf32, #tpu.memory_space<vmem>>, vector<128x384xf32>
    %cst_9 = arith.constant dense<0.000000e+00> : vector<8x384xf32>
    %8 = tpu.matmul %1, %7, %cst_9 {dimension_numbers = #tpu.dot_dimension_numbers<[1], [0], [0], [1], [0, 0, 1, 1], [], []>} : vector<8x128xf32>, vector<128x384xf32>, vector<8x384xf32> -> vector<8x384xf32>
    %9 = vector.extract_strided_slice %6 {offsets = [0, 0], sizes = [8, 128], strides = [1, 1]} : vector<8x384xf32> to vector<8x128xf32>
    %10 = vector.extract_strided_slice %6 {offsets = [0, 128], sizes = [8, 128], strides = [1, 1]} : vector<8x384xf32> to vector<8x128xf32>
    %11 = vector.extract_strided_slice %6 {offsets = [0, 256], sizes = [8, 128], strides = [1, 1]} : vector<8x384xf32> to vector<8x128xf32>
    %12 = vector.extract_strided_slice %8 {offsets = [0, 0], sizes = [8, 128], strides = [1, 1]} : vector<8x384xf32> to vector<8x128xf32>
    %13 = vector.extract_strided_slice %8 {offsets = [0, 128], sizes = [8, 128], strides = [1, 1]} : vector<8x384xf32> to vector<8x128xf32>
    %14 = vector.extract_strided_slice %8 {offsets = [0, 256], sizes = [8, 128], strides = [1, 1]} : vector<8x384xf32> to vector<8x128xf32>
    %15 = arith.addf %9, %12 : vector<8x128xf32>
    %16 = arith.negf %15 : vector<8x128xf32>
    %17 = math.exp %16 : vector<8x128xf32>
    %cst_10 = arith.constant 1.000000e+00 : f32
    %18 = vector.broadcast %cst_10 : f32 to vector<8x128xf32>
    %19 = arith.addf %18, %17 : vector<8x128xf32>
    %20 = arith.divf %18, %19 : vector<8x128xf32>
    %21 = arith.addf %10, %13 : vector<8x128xf32>
    %22 = arith.negf %21 : vector<8x128xf32>
    %23 = math.exp %22 : vector<8x128xf32>
    %cst_11 = arith.constant 1.000000e+00 : f32
    %24 = vector.broadcast %cst_11 : f32 to vector<8x128xf32>
    %25 = arith.addf %24, %23 : vector<8x128xf32>
    %26 = arith.divf %24, %25 : vector<8x128xf32>
    %c0_12 = arith.constant 0 : index
    %c0_13 = arith.constant 0 : index
    %27 = vector.load %arg6[%c0_12, %c0_13] : memref<1x128xf32, #tpu.memory_space<vmem>>, vector<1x128xf32>
    %28 = vector.broadcast %27 : vector<1x128xf32> to vector<8x128xf32>
    %29 = arith.addf %14, %28 : vector<8x128xf32>
    %30 = arith.mulf %20, %29 : vector<8x128xf32>
    %31 = arith.addf %11, %30 : vector<8x128xf32>
    %32 = math.tanh %31 : vector<8x128xf32>
    %33 = arith.subf %1, %32 : vector<8x128xf32>
    %34 = arith.mulf %26, %33 : vector<8x128xf32>
    %35 = arith.addf %32, %34 : vector<8x128xf32>
    %c0_14 = arith.constant 0 : index
    %c0_15 = arith.constant 0 : index
    %36 = vector.load %arg7[%c0_14, %c0_15] : memref<8x128xf32, #tpu.memory_space<vmem>>, vector<8x128xf32>
    tpu.vector_store %arg7[%c0_14, %c0_15], %35 {strides = array<i32>} : memref<8x128xf32, #tpu.memory_space<vmem>>, vector<8x128xf32>,
    return
  }
  func.func @transform_0(%arg0: i32) -> (i32, i32) {
    %c0_i32 = arith.constant 0 : i32
    %c0_i32_0 = arith.constant 0 : i32
    return %arg0, %c0_i32 : i32, i32
  }
  func.func @transform_1(%arg0: i32) -> (i32, i32) {
    %c0_i32 = arith.constant 0 : i32
    %c0_i32_0 = arith.constant 0 : i32
    return %arg0, %c0_i32 : i32, i32
  }
  func.func @transform_2(%arg0: i32) -> (i32, i32) {
    %c0_i32 = arith.constant 0 : i32
    %c0_i32_0 = arith.constant 0 : i32
    %c0_i32_1 = arith.constant 0 : i32
    return %c0_i32, %c0_i32_0 : i32, i32
  }
  func.func @transform_3(%arg0: i32) -> (i32, i32) {
    %c0_i32 = arith.constant 0 : i32
    %c0_i32_0 = arith.constant 0 : i32
    %c0_i32_1 = arith.constant 0 : i32
    return %c0_i32, %c0_i32_0 : i32, i32
  }
  func.func @transform_4(%arg0: i32) -> (i32, i32) {
    %c0_i32 = arith.constant 0 : i32
    %c0_i32_0 = arith.constant 0 : i32
    %c0_i32_1 = arith.constant 0 : i32
    return %c0_i32, %c0_i32_0 : i32, i32
  }
  func.func @transform_5(%arg0: i32) -> (i32, i32) {
    %c0_i32 = arith.constant 0 : i32
    %c0_i32_0 = arith.constant 0 : i32
    %c0_i32_1 = arith.constant 0 : i32
    return %c0_i32, %c0_i32_0 : i32, i32
  }
  func.func @transform_6(%arg0: i32) -> (i32, i32) {
    %c0_i32 = arith.constant 0 : i32
    %c0_i32_0 = arith.constant 0 : i32
    return %arg0, %c0_i32 : i32, i32
  }
}

</mosaic_0001>

<bundles_post_ra>
// kernel: tpu_custom_call.1
= control target key start
LH: loop header
LB: loop body
LE: loop exit
PB: predicated region body
PF: predicated region fallthrough
CT: control target
= control target key end

     0   :  { %11 = vsyncpa [#allocation3], 0  ;;  %s602_s0 = inlined_call_operand.hbm [shape: f32[8,128], index: 0, kind: input, shape index: {}]   ;;  %s603_s1 = inlined_call_operand.hbm [shape: f32[8,128], index: 1, kind: input, shape index: {}]   ;;  %s604_s2 = inlined_call_operand.hbm [shape: f32[128,384], index: 2, kind: input, shape index: {}]   ;;  %s605_s3 = inlined_call_operand.hbm [shape: f32[128,384], index: 3, kind: input, shape index: {}]   ;;  %s606_s4 = inlined_call_operand.vmem [shape: f32[1,384], index: 4, kind: input, shape index: {}]   ;;  %s607_s5 = inlined_call_operand.vmem [shape: f32[1,128], index: 5, kind: input, shape index: {}]   ;;  %s608_s6 = inlined_call_operand.hbm [shape: f32[8,128], index: 6, kind: output, shape index: {}]  }
   0x1   :  { %12 = vsyncpa [#allocation6], 0 }
   0x2   :  { %13 = vsyncpa [#allocation9], 0  ;;  %s31_s23 = sshll.u32 %s603_s1, 4  ;;  %s32_s23 = int_to_ptr.hbm [resolvable:$true] %s31_s23 }
   0x3   :  { %14 = vsyncpa [#allocation4], 0  ;;  %s528_s24 = smov [#allocation5]   ;;  %s20_s28 = sshll.u32 %s602_s0, 4  ;;  %s21_s28 = int_to_ptr.hbm [resolvable:$true] %s20_s28 }
   0x4   :  { %s33_s25 = sshll.u32 %s528_s24, 4  ;;  %s529_s29 = smov [#allocation2]   ;;  %s34_s25 = int_to_ptr.vmem [resolvable:$true] %s33_s25 }
   0x5   :  { %36 = dma.hbm_to_vmem [thread:$0]  %s32_s23, 128, %s34_s25, [#allocation6]  }
   0x6   :  { %s22_s30 = sshll.u32 %s529_s29, 4  ;;  %s41_s9 = sshll.u32 %s604_s2, 4  ;;  %s23_s30 = int_to_ptr.vmem [resolvable:$true] %s22_s30  ;;  %s42_s9 = int_to_ptr.hbm [resolvable:$true] %s41_s9 }
   0x7   :  { %25 = dma.hbm_to_vmem [thread:$0]  %s21_s28, 128, %s23_s30, [#allocation3]  }
   0x8   :  { %s530_s1 = smov [#allocation7]   ;;  %s54_s13 = sshll.u32 %s605_s3, 4  ;;  %s55_s13 = int_to_ptr.hbm [resolvable:$true] %s54_s13 }
   0x9   :  { %s43_s10 = sshll.u32 %s530_s1, 4  ;;  %s531_s14 = smov 384   ;;  %s44_s10 = int_to_ptr.vmem [resolvable:$true] %s43_s10 }
   0xa   :  { %s532_s0 = smov 24   ;;  %s533_s15 = smov [#allocation8]  }
   0xb   :  { %49 = dma.hbm_to_vmem [thread:$0]  %s42_s9, 6144, %s44_s10, [#allocation6], %s531_s14, %s531_s14, %s532_s0  }
   0xc   :  { %s56_s16 = sshll.u32 %s533_s15, 4  ;;  %s57_s16 = int_to_ptr.vmem [resolvable:$true] %s56_s16 }
   0xd   :  { %62 = dma.hbm_to_vmem [thread:$0]  %s55_s13, 6144, %s57_s16, [#allocation9], %s531_s14, %s531_s14, %s532_s0  }
   0xe   :  { %520 = dma.done.wait [#allocation3], 128  }
   0xf   :  { %521 = vsyncadd [#allocation3], 4294967168 }
  0x10   :  { %522 = dma.done.wait [#allocation6], 6272  }
  0x11   :  { %523 = vsyncadd [#allocation6], 4294961024 }
  0x12   :  { %524 = dma.done.wait [#allocation9], 6144  }
  0x13   :  { %525 = vsyncadd [#allocation9], 4294961152  ;;  %v130_v0 = vld [vmem:[#allocation7 + $0x168] sm:$0xff]  ;;  %v127_v2 = vld [vmem:[#allocation7 + $0x150] sm:$0xff]  ;;  %s368_s21 = sshll.u32 %s608_s6, 4  ;;  %s369_s21 = int_to_ptr.hbm [resolvable:$true] %s368_s21 }
  0x14   :  { %v246_v1 = vld [vmem:[#allocation8 + $0x168] sm:$0xff]  ;;  %141 = vmatpush.msra.mxu0 %v130_v0  ;;  %v243_v3 = vld [vmem:[#allocation8 + $0x150] sm:$0xff]  ;;  %v124_v5 = vld [vmem:[#allocation7 + $0x138] sm:$0xff] }
  0x15   :  { %249 = vmatpush.msra.mxu3 %v246_v1  ;;  %v131_v4 = vld [vmem:[#allocation7 + $0x170] sm:$0xff]  ;;  %v240_v6 = vld [vmem:[#allocation8 + $0x138] sm:$0xff]  ;;  %v125_v8 = vld [vmem:[#allocation7 + $0x140] sm:$0xff] }
  0x16   :  { %161 = vmatpush.msra.mxu1 %v131_v4  ;;  %v128_v7 = vld [vmem:[#allocation7 + $0x158] sm:$0xff]  ;;  %142 = vmatpush.msra.mxu0 %v127_v2  ;;  %v121_v9 = vld [vmem:[#allocation7 + $0x120] sm:$0xff]  ;;  %v122_v11 = vld [vmem:[#allocation7 + $0x128] sm:$0xff] }
  0x17   :  { %250 = vmatpush.msra.mxu3 %v243_v3  ;;  %v237_v10 = vld [vmem:[#allocation8 + $0x120] sm:$0xff]  ;;  %v118_v12 = vld [vmem:[#allocation7 + $0x108] sm:$0xff]  ;;  %v119_v14 = vld [vmem:[#allocation7 + $0x110] sm:$0xff] }
  0x18   :  { %162 = vmatpush.msra.mxu1 %v128_v7  ;;  %143 = vmatpush.msra.mxu0 %v124_v5  ;;  %v234_v13 = vld [vmem:[#allocation8 + $0x108] sm:$0xff]  ;;  %v115_v15 = vld [vmem:[#allocation7 + $0xf0] sm:$0xff]  ;;  %v116_v17 = vld [vmem:[#allocation7 + $0xf8] sm:$0xff] }
  0x19   :  { %251 = vmatpush.msra.mxu3 %v240_v6  ;;  %v231_v16 = vld [vmem:[#allocation8 + $0xf0] sm:$0xff]  ;;  %v112_v18 = vld [vmem:[#allocation7 + $0xd8] sm:$0xff]  ;;  %v113_v20 = vld [vmem:[#allocation7 + $0xe0] sm:$0xff] }
  0x1a   :  { %163 = vmatpush.msra.mxu1 %v125_v8  ;;  %144 = vmatpush.msra.mxu0 %v121_v9  ;;  %v228_v19 = vld [vmem:[#allocation8 + $0xd8] sm:$0xff]  ;;  %v109_v21 = vld [vmem:[#allocation7 + $0xc0] sm:$0xff]  ;;  %v110_v23 = vld [vmem:[#allocation7 + $0xc8] sm:$0xff] }
  0x1b   :  { %252 = vmatpush.msra.mxu3 %v237_v10  ;;  %v225_v22 = vld [vmem:[#allocation8 + $0xc0] sm:$0xff]  ;;  %v106_v24 = vld [vmem:[#allocation7 + $0xa8] sm:$0xff]  ;;  %v107_v26 = vld [vmem:[#allocation7 + $0xb0] sm:$0xff] }
  0x1c   :  { %164 = vmatpush.msra.mxu1 %v122_v11  ;;  %145 = vmatpush.msra.mxu0 %v118_v12  ;;  %v222_v25 = vld [vmem:[#allocation8 + $0xa8] sm:$0xff]  ;;  %v132_v27 = vld [vmem:[#allocation7 + $0x178] sm:$0xff]  ;;  %v103_v28 = vld [vmem:[#allocation7 + $0x90] sm:$0xff] }
  0x1d   :  { %253 = vmatpush.msra.mxu3 %v234_v13  ;;  %v219_v29 = vld [vmem:[#allocation8 + $0x90] sm:$0xff]  ;;  %181 = vmatpush.msra.mxu2 %v132_v27  ;;  %v129_v30 = vld [vmem:[#allocation7 + $0x160] sm:$0xff]  ;;  %v104_v31 = vld [vmem:[#allocation7 + $0x98] sm:$0xff] }
  0x1e   :  { %165 = vmatpush.msra.mxu1 %v119_v14  ;;  %146 = vmatpush.msra.mxu0 %v115_v15  ;;  %v126_v32 = vld [vmem:[#allocation7 + $0x148] sm:$0xff]  ;;  %v100_v33 = vld [vmem:[#allocation7 + $0x78] sm:$0xff]  ;;  %v101_v35 = vld [vmem:[#allocation7 + $0x80] sm:$0xff] }
  0x1f   :  { %254 = vmatpush.msra.mxu3 %v231_v16  ;;  %v216_v34 = vld [vmem:[#allocation8 + $0x78] sm:$0xff]  ;;  %182 = vmatpush.msra.mxu2 %v129_v30  ;;  %v123_v36 = vld [vmem:[#allocation7 + $0x130] sm:$0xff]  ;;  %v97_v37 = vld [vmem:[#allocation7 + $0x60] sm:$0xff] }
  0x20   :  { %166 = vmatpush.msra.mxu1 %v116_v17  ;;  %147 = vmatpush.msra.mxu0 %v112_v18  ;;  %v213_v38 = vld [vmem:[#allocation8 + $0x60] sm:$0xff]  ;;  %v98_v39 = vld [vmem:[#allocation7 + $0x68] sm:$0xff]  ;;  %v120_v40 = vld [vmem:[#allocation7 + $0x118] sm:$0xff] }
  0x21   :  { %255 = vmatpush.msra.mxu3 %v228_v19  ;;  %183 = vmatpush.msra.mxu2 %v126_v32  ;;  %v94_v41 = vld [vmem:[#allocation7 + $0x48] sm:$0xff]  ;;  %v95_v43 = vld [vmem:[#allocation7 + $0x50] sm:$0xff]  ;;  %v117_v44 = vld [vmem:[#allocation7 + $0x100] sm:$0xff] }
  0x22   :  { %167 = vmatpush.msra.mxu1 %v113_v20  ;;  %148 = vmatpush.msra.mxu0 %v109_v21  ;;  %v210_v42 = vld [vmem:[#allocation8 + $0x48] sm:$0xff]  ;;  %v91_v45 = vld [vmem:[#allocation7 + $0x30] sm:$0xff]  ;;  %v92_v47 = vld [vmem:[#allocation7 + $0x38] sm:$0xff] }
  0x23   :  { %256 = vmatpush.msra.mxu3 %v225_v22  ;;  %184 = vmatpush.msra.mxu2 %v123_v36  ;;  %v207_v46 = vld [vmem:[#allocation8 + $0x30] sm:$0xff]  ;;  %v114_v48 = vld [vmem:[#allocation7 + $0xe8] sm:$0xff]  ;;  %v88_v49 = vld [vmem:[#allocation7 + $0x18] sm:$0xff] }
  0x24   :  { %168 = vmatpush.msra.mxu1 %v110_v23  ;;  %149 = vmatpush.msra.mxu0 %v106_v24  ;;  %v204_v50 = vld [vmem:[#allocation8 + $0x18] sm:$0xff]  ;;  %v89_v51 = vld [vmem:[#allocation7 + $0x20] sm:$0xff]  ;;  %v111_v52 = vld [vmem:[#allocation7 + $0xd0] sm:$0xff] }
  0x25   :  { %257 = vmatpush.msra.mxu3 %v222_v25  ;;  %185 = vmatpush.msra.mxu2 %v120_v40  ;;  %v85_v53 = vld [vmem:[#allocation7] sm:$0xff]  ;;  %v582_v55 = vld [vmem:[#allocation5] sm:$0xff]  ;;  %v247_v56 = vld [vmem:[#allocation8 + $0x170] sm:$0xff] }
  0x26   :  { %169 = vmatpush.msra.mxu1 %v107_v26  ;;  %150 = vmatpush.msra.mxu0 %v103_v28  ;;  %v201_v54 = vld [vmem:[#allocation8] sm:$0xff]  ;;  %v86_v57 = vld [vmem:[#allocation7 + $0x8] sm:$0xff]  ;;  %v584_v58 = vld [vmem:[#allocation2] sm:$0xff] }
  0x27   :  { %258 = vmatpush.msra.mxu3 %v219_v29  ;;  %186 = vmatpush.msra.mxu2 %v117_v44  ;;  %v244_v59 = vld [vmem:[#allocation8 + $0x158] sm:$0xff]  ;;  %v241_v62 = vld [vmem:[#allocation8 + $0x140] sm:$0xff]  ;;  %v238_v1 = vld [vmem:[#allocation8 + $0x128] sm:$0xff] }
  0x28   :  { %170 = vmatpush.msra.mxu1 %v104_v31  ;;  %151 = vmatpush.msra.mxu0 %v100_v33  ;;  %v248_v60 = vld [vmem:[#allocation8 + $0x178] sm:$0xff]  ;;  %v245_v63 = vld [vmem:[#allocation8 + $0x160] sm:$0xff]  ;;  %v242_v2 = vld [vmem:[#allocation8 + $0x148] sm:$0xff] }
  0x29   :  { %259 = vmatpush.msra.mxu3 %v216_v34  ;;  %187 = vmatpush.msra.mxu2 %v114_v48  ;;  %v108_v61 = vld [vmem:[#allocation7 + $0xb8] sm:$0xff]  ;;  %v105_v0 = vld [vmem:[#allocation7 + $0xa0] sm:$0xff]  ;;  %v102_v3 = vld [vmem:[#allocation7 + $0x88] sm:$0xff] }
  0x2a   :  { %171 = vmatpush.msra.mxu1 %v101_v35  ;;  %152 = vmatpush.msra.mxu0 %v97_v37  ;;  %v235_v4 = vld [vmem:[#allocation8 + $0x110] sm:$0xff]  ;;  %v232_v7 = vld [vmem:[#allocation8 + $0xf8] sm:$0xff]  ;;  %v229_v10 = vld [vmem:[#allocation8 + $0xe0] sm:$0xff] }
  0x2b   :  { %260 = vmatpush.msra.mxu3 %v213_v38  ;;  %188 = vmatpush.msra.mxu2 %v111_v52  ;;  %v239_v5 = vld [vmem:[#allocation8 + $0x130] sm:$0xff]  ;;  %v236_v8 = vld [vmem:[#allocation8 + $0x118] sm:$0xff]  ;;  %v233_v11 = vld [vmem:[#allocation8 + $0x100] sm:$0xff] }
  0x2c   :  { %172 = vmatpush.msra.mxu1 %v98_v39  ;;  %153 = vmatpush.msra.mxu0 %v94_v41  ;;  %v99_v6 = vld [vmem:[#allocation7 + $0x70] sm:$0xff]  ;;  %v96_v9 = vld [vmem:[#allocation7 + $0x58] sm:$0xff]  ;;  %v93_v12 = vld [vmem:[#allocation7 + $0x40] sm:$0xff] }
  0x2d   :  { %261 = vmatpush.msra.mxu3 %v210_v42  ;;  %189 = vmatpush.msra.mxu2 %v108_v61  ;;  %v226_v13 = vld [vmem:[#allocation8 + $0xc8] sm:$0xff]  ;;  %v223_v16 = vld [vmem:[#allocation8 + $0xb0] sm:$0xff]  ;;  %v220_v19 = vld [vmem:[#allocation8 + $0x98] sm:$0xff] }
  0x2e   :  { %173 = vmatpush.msra.mxu1 %v95_v43  ;;  %154 = vmatpush.msra.mxu0 %v91_v45  ;;  %v230_v14 = vld [vmem:[#allocation8 + $0xe8] sm:$0xff]  ;;  %v227_v17 = vld [vmem:[#allocation8 + $0xd0] sm:$0xff]  ;;  %v224_v20 = vld [vmem:[#allocation8 + $0xb8] sm:$0xff] }
  0x2f   :  { %262 = vmatpush.msra.mxu3 %v207_v46  ;;  %190 = vmatpush.msra.mxu2 %v105_v0  ;;  %v90_v15 = vld [vmem:[#allocation7 + $0x28] sm:$0xff]  ;;  %v87_v18 = vld [vmem:[#allocation7 + $0x10] sm:$0xff]  ;;  %v217_v21 = vld [vmem:[#allocation8 + $0x80] sm:$0xff] }
  0x30   :  { %174 = vmatpush.msra.mxu1 %v92_v47  ;;  %155 = vmatpush.msra.mxu0 %v88_v49  ;;  %v221_v22 = vld [vmem:[#allocation8 + $0xa0] sm:$0xff]  ;;  %v214_v23 = vld [vmem:[#allocation8 + $0x68] sm:$0xff]  ;;  %v211_v25 = vld [vmem:[#allocation8 + $0x50] sm:$0xff] }
  0x31   :  { %263 = vmatpush.msra.mxu3 %v204_v50  ;;  %191 = vmatpush.msra.mxu2 %v102_v3  ;;  %v218_v24 = vld [vmem:[#allocation8 + $0x88] sm:$0xff]  ;;  %v215_v26 = vld [vmem:[#allocation8 + $0x70] sm:$0xff]  ;;  %v208_v27 = vld [vmem:[#allocation8 + $0x38] sm:$0xff] }
  0x32   :  { %175 = vmatpush.msra.mxu1 %v89_v51  ;;  %156 = vmatpush.msra.mxu0 %v85_v53  ;;  %v212_v28 = vld [vmem:[#allocation8 + $0x58] sm:$0xff]  ;;  %v205_v29 = vld [vmem:[#allocation8 + $0x20] sm:$0xff]  ;;  %v202_v31 = vld [vmem:[#allocation8 + $0x8] sm:$0xff] }
  0x33   :  { %264 = vmatpush.msra.mxu3 %v201_v54  ;;  %157 = vmatmul.f32.vlgmr.msra.gmra.mxu0 %v584_v58  ;;  %v209_v30 = vld [vmem:[#allocation8 + $0x40] sm:$0xff]  ;;  %v206_v32 = vld [vmem:[#allocation8 + $0x28] sm:$0xff]  ;;  %v203_v33 = vld [vmem:[#allocation8 + $0x10] sm:$0xff] }
  0x34   :  { %265 = vmatmul.f32.vlgmr.msra.gmra.mxu3 %v582_v55  ;;  %269 = vmatpush.msrb.mxu0 %v247_v56  ;;  %v133_v34 = vld [vmem:[%s606_s4] sm:$0x7] }
  0x35   :  { %176 = vmatpush.msra.mxu1 %v86_v57  ;;  %192 = vmatpush.msra.mxu2 %v99_v6  ;;  %v135_v35 = vperm.slane %v133_v34, 0  ;;  %v136_v43 = vperm.slane %v133_v34, 1  ;;  %v389_v57 = vld [vmem:[%s607_s5] ss:$0 sm:$0xff]  ;;  %s534_s5 = smov [#allocation10]  }
  0x36   :  { %270 = vmatpush.msrb.mxu0 %v244_v59  ;;  %177 = vmatmul.f32.vlgmr.msra.gmra.mxu1 %v584_v58  ;;  %s366_s18 = sshll.u32 %s534_s5, 4  ;;  %s367_s18 = int_to_ptr.vmem [resolvable:$true] %s366_s18 }
  0x37   :  { %289 = vmatpush.msrb.mxu1 %v248_v60  ;;  %193 = vmatpush.msra.mxu2 %v96_v9 }
  0x38   :  { %271 = vmatpush.msrb.mxu0 %v241_v62  ;;  %v137_v62 = vperm.slane %v133_v34, 2 }
  0x39   :  { %290 = vmatpush.msrb.mxu1 %v245_v63  ;;  %194 = vmatpush.msra.mxu2 %v93_v12 }
  0x3a   :  { %272 = vmatpush.msrb.mxu0 %v238_v1 }
  0x3b   :  { %291 = vmatpush.msrb.mxu1 %v242_v2  ;;  %195 = vmatpush.msra.mxu2 %v90_v15 }
  0x3c   :  { %273 = vmatpush.msrb.mxu0 %v235_v4 }
  0x3d   :  { %292 = vmatpush.msrb.mxu1 %v239_v5  ;;  %196 = vmatpush.msra.mxu2 %v87_v18 }
  0x3e   :  { %274 = vmatpush.msrb.mxu0 %v232_v7  ;;  %197 = vmatmul.f32.vlgmr.msra.gmra.mxu2 %v584_v58 }
  0x3f   :  { %293 = vmatpush.msrb.mxu1 %v236_v8 }
  0x40   :  { %275 = vmatpush.msrb.mxu0 %v229_v10 }
  0x41   :  { %294 = vmatpush.msrb.mxu1 %v233_v11 }
  0x42   :  { %276 = vmatpush.msrb.mxu0 %v226_v13 }
  0x43   :  { %295 = vmatpush.msrb.mxu1 %v230_v14 }
  0x44   :  { %277 = vmatpush.msrb.mxu0 %v223_v16 }
  0x45   :  { %296 = vmatpush.msrb.mxu1 %v227_v17 }
  0x46   :  { %278 = vmatpush.msrb.mxu0 %v220_v19 }
  0x47   :  { %297 = vmatpush.msrb.mxu1 %v224_v20 }
  0x48   :  { %279 = vmatpush.msrb.mxu0 %v217_v21 }
  0x49   :  { %298 = vmatpush.msrb.mxu1 %v221_v22 }
  0x4a   :  { %280 = vmatpush.msrb.mxu0 %v214_v23 }
  0x4b   :  { %299 = vmatpush.msrb.mxu1 %v218_v24 }
  0x4c   :  { %281 = vmatpush.msrb.mxu0 %v211_v25 }
  0x4d   :  { %300 = vmatpush.msrb.mxu1 %v215_v26 }
  0x4e   :  { %282 = vmatpush.msrb.mxu0 %v208_v27 }
  0x4f   :  { %301 = vmatpush.msrb.mxu1 %v212_v28 }
  0x50   :  { %283 = vmatpush.msrb.mxu0 %v205_v29 }
  0x51   :  { %302 = vmatpush.msrb.mxu1 %v209_v30 }
  0x52   :  { %284 = vmatpush.msrb.mxu0 %v202_v31 }
  0x53   :  { %303 = vmatpush.msrb.mxu1 %v206_v32  ;;  %285 = vmatmul.f32.vlgmr.msrb.gmra.mxu0 %v582_v55 }
  0x55   :  { %304 = vmatpush.msrb.mxu1 %v203_v33 }
  0x56   :  { %305 = vmatmul.f32.vlgmr.msrb.gmra.mxu1 %v582_v55 }
  0xb0   :  { %v158_v36 = vpop.f32.mrf.mxu0 }
  0xb1   :  { %v159_v37 = vadd.f32 %v158_v36, %v135_v35 }
  0xb3   :  { %v178_v45 = vpop.f32.mrf.mxu1 }
  0xb4   :  { %v179_v47 = vadd.f32 %v178_v45, %v136_v43 }
  0xb7   :  { %v266_v38 = vpop.f32.mrf.mxu3 }
  0xb8   :  { %v309_v39 = vadd.f32 %v266_v38, %v159_v37 }
  0xba   :  { %v380_v40 = vmul.f32 -1.442695, %v309_v39 }
  0xbc   :  { %390 = vpow2.f32 %v380_v40 }
  0xc1   :  { %v198_v0 = vpop.f32.mrf.mxu2 }
  0xc2   :  { %v391_v41 = vpop.eup %390  ;;  %v199_v4 = vadd.f32 %v198_v0, %v137_v62 }
  0xc3   :  { %v313_v42 = vadd.f32 1.0, %v391_v41 }
  0xc5   :  { %392 = vrcp.f32 %v313_v42  ;;  %vm319_vm0 = vweird.f32 %v313_v42  ;;  %v325_v52 = vand.u32 2147483648, %v313_v42  ;;  %v323_v54 = vand.u32 2147483647, %v313_v42 }
  0xc7   :  { %v326_v59 = vor.u32 1.1754944e-38, %v325_v52  ;;  %vm324_vm3 = vcmp.eq.f32.partialorder %v323_v54, 8.507059e+37 }
  0xcb   :  { %v393_v44 = vpop.eup %392 }
  0xcc   :  { %v315_v46 = vmul.f32 %v393_v44, %v313_v42  ;;  %vm320_vm1 = vweird.f32 %v393_v44 }
  0xcd   :  { %vm321_vm2 = vmor %vm319_vm0, %vm320_vm1 }
  0xce   :  { %v316_v48 = vsub.f32 1.0, %v315_v46 }
  0xd0   :  { %v286_v49 = vpop.f32.mrf.mxu0  ;;  %v317_v50 = vmul.f32 %v393_v44, %v316_v48 }
  0xd1   :  { %v329_v51 = vadd.f32 %v286_v49, %v179_v47 }
  0xd2   :  { %v318_v53 = vadd.f32 %v393_v44, %v317_v50 }
  0xd3   :  { %v381_v56 = vmul.f32 -1.442695, %v329_v51  ;;  %v306_v58 = vpop.f32.mrf.mxu1 }
  0xd4   :  { %v322_v60 = vsel %vm321_vm2, %v393_v44, %v318_v53  ;;  %v353_v61 = vadd.f32 %v389_v57, %v306_v58 }
  0xd5   :  { %394 = vpow2.f32 %v381_v56  ;;  %v327_v63 = vsel %vm324_vm3, %v326_v59, %v322_v60 }
  0xd6   :  { %v354_v3 = vmul.f32 %v353_v61, %v327_v63 }
  0xd8   :  { %v355_v5 = vadd.f32 %v354_v3, %v199_v4 }
  0xdb   :  { %v395_v1 = vpop.eup %394 }
  0xdc   :  { %v333_v2 = vadd.f32 1.0, %v395_v1 }
  0xde   :  { %396 = vrcp.f32 %v333_v2  ;;  %v345_v9 = vand.u32 2147483648, %v333_v2  ;;  %v343_v11 = vand.u32 2147483647, %v333_v2  ;;  %vm339_vm5 = vweird.f32 %v333_v2 }
  0xdf   :  { %398 = vtanh.f32 %v355_v5 }
  0xe0   :  { %v346_v14 = vor.u32 1.1754944e-38, %v345_v9  ;;  %vm344_vm7 = vcmp.eq.f32.partialorder %v343_v11, 8.507059e+37 }
  0xe4   :  { %v397_v6 = vpop.eup %396 }
  0xe5   :  { %v335_v7 = vmul.f32 %v397_v6, %v333_v2  ;;  %vm340_vm4 = vweird.f32 %v397_v6  ;;  %v399_v12 = vpop.eup %398 }
  0xe6   :  { %vm341_vm6 = vmor %vm339_vm5, %vm340_vm4  ;;  %v357_v16 = vsub.f32 %v582_v55, %v399_v12 }
  0xe7   :  { %v336_v8 = vsub.f32 1.0, %v335_v7 }
  0xe9   :  { %v337_v10 = vmul.f32 %v397_v6, %v336_v8 }
  0xeb   :  { %v338_v13 = vadd.f32 %v397_v6, %v337_v10 }
  0xed   :  { %v342_v15 = vsel %vm341_vm6, %v397_v6, %v338_v13 }
  0xee   :  { %v347_v17 = vsel %vm344_vm7, %v346_v14, %v342_v15 }
  0xef   :  { %v358_v18 = vmul.f32 %v357_v16, %v347_v17 }
  0xf1   :  { %v359_v19 = vadd.f32 %v399_v12, %v358_v18 }
  0xf3   :  { %360 = vst [vmem:[#allocation10] sm:$0xff] %v359_v19 }
  0xf4   :  { %371 = dma.vmem_to_hbm [thread:$0]  %s367_s18, 128, %s369_s21, [#allocation4]  }
  0xf5   :  { %526 = dma.done.wait [#allocation4], 128  }
  0xf6   :  { %527 = vsyncadd [#allocation4], 4294967168 }
  0xf7   :  { %376 = vsyncpa [#allocation3], 1 }
  0xf8   :  { %377 = vsyncpa [#allocation6], 1 }
  0xf9   :  { %378 = vsyncpa [#allocation9], 1 }
  0xfa   :  { %379 = vsyncpa [#allocation4], 1 }

</bundles_post_ra>
